<compile_context>
chip_gen: v6e
topology: v6e:2x2x1
jax: 0.10.0
libtpu: 0.0.40
codegen_flags: <defaults>
</compile_context>

<pallas_src>
import jax
import jax.numpy as jnp
from jax.experimental import pallas as pl
from jax.experimental.pallas import tpu as pltpu


def _device_block_config():
    """Returns (per-input per-block byte budget, vmem_limit_bytes or None)."""
    try:
        kind = jax.devices()[0].device_kind.lower()
    except Exception:  # pragma: no cover - defensive
        kind = ""
    if "v7" in kind:
        # 64 MiB physical VMEM: 6 MiB/input * 2 inputs * 2 buffers = 24 MiB.
        return 6 * 1024 * 1024, 48 << 20
    if "v6" in kind or "trillium" in kind:
        # 128 MiB physical VMEM; raise the 32 MiB scoped default.
        return 6 * 1024 * 1024, 48 << 20
    # v5e (16 MiB scoped default) and unknown chips: stay conservative.
    return 3 * 1024 * 1024, None


def _make_kernel(f, tf, kb, need_mask):
    """Builds the per-tile kernel; f/tf/kb/need_mask are static Python values."""

    def kernel(est_ref, gt_ref, out_ref, acc_ref):
        # est_ref / gt_ref : (TN, TF) tile of the (N, F) inputs
        # out_ref          : (1, TN, 1) tile of the (G, NB*TN, 1) partial sums
        # acc_ref          : (TN, 1) f32 accumulator, persists across k steps
        k = pl.program_id(2)

        @pl.when(k == 0)
        def _():
            acc_ref[...] = jnp.zeros_like(acc_ref)

        diff = est_ref[...].astype(jnp.float32) - gt_ref[...].astype(jnp.float32)
        if need_mask:
            # Boundary blocks contain unspecified data past column f; zero it.
            g = pl.program_id(1)
            start = (g * kb + k) * tf
            col = jax.lax.broadcasted_iota(jnp.int32, diff.shape, 1)
            diff = jnp.where(col + start < f, diff, 0.0)
        acc_ref[...] += jnp.sum(diff, axis=-1, keepdims=True)

        @pl.when(k == kb - 1)
        def _():
            out_ref[...] = acc_ref[...][None, :, :]

    return kernel


def se_batch(estimated_density_map, gt_map, block_bytes_override=None):
    """Pallas implementation of SEBatch.forward.

    Args:
      estimated_density_map: (N, C, H, W) float array
      gt_map:                (N, C, H, W) float array
      block_bytes_override:  optional per-input per-block byte budget (testing)
    Returns:
      (N,) float32 array: squared sum of per-sample differences.
    """
    assert estimated_density_map.shape == gt_map.shape
    n = estimated_density_map.shape[0]
    f = 1
    for d in estimated_density_map.shape[1:]:
        f *= d

    dtype = estimated_density_map.dtype
    itemsize = jnp.dtype(dtype).itemsize
    # Full-height packed tiles: 8 for f32, 16 for bf16, 32 for int8/fp8.
    tn_base = max(8, 32 // itemsize)

    block_bytes, vmem_limit = _device_block_config()
    if block_bytes_override is not None:
        block_bytes = block_bytes_override

    # Feature tile: one lane-dense block if it fits the budget at tn_base rows,
    # otherwise the largest 128-multiple that does.
    if f * itemsize * tn_base <= block_bytes:
        tf = f                                   # equal-to-full-dim block
    else:
        tf = max((block_bytes // (tn_base * itemsize)) // 128 * 128, 128)
    f_blocks = pl.cdiv(f, tf)

    # Batch tile: fill the byte budget along N when F is small.
    rows_budget = max(block_bytes // (tf * itemsize), tn_base)
    if rows_budget >= n:
        tn, nb = n, 1                            # single N block, exact height
    else:
        tn = (rows_budget // tn_base) * tn_base  # multiple of tn_base (>= 8)
        nb = pl.cdiv(n, tn)

    # Give both v7x TensorCores work when the batch axis alone cannot.
    num_groups = 2 if (nb == 1 and f_blocks >= 2) else 1
    kb = pl.cdiv(f_blocks, num_groups)

    need_mask = (f % tf != 0) or (num_groups * kb != f_blocks)

    est2d = estimated_density_map.reshape(n, f)
    gt2d = gt_map.reshape(n, f)

    last_fblock = f_blocks - 1
    if num_groups * kb == f_blocks:
        def in_map(i, g, k):
            return (i, g * kb + k)
    else:
        # The last group has trailing steps past the data; clamp the block
        # index (the kernel mask zeroes their contribution anyway).
        def in_map(i, g, k):
            return (i, jnp.minimum(g * kb + k, last_fblock))

    kernel = _make_kernel(f, tf, kb, need_mask)

    cp_kwargs = dict(dimension_semantics=("parallel", "parallel", "arbitrary"))
    if vmem_limit is not None:
        cp_kwargs["vmem_limit_bytes"] = vmem_limit

    partials = pl.pallas_call(
        kernel,
        out_shape=jax.ShapeDtypeStruct((num_groups, nb * tn, 1), jnp.float32),
        grid=(nb, num_groups, kb),
        in_specs=[
            pl.BlockSpec((tn, tf), in_map),
            pl.BlockSpec((tn, tf), in_map),
        ],
        out_specs=pl.BlockSpec((1, tn, 1), lambda i, g, k: (g, i, 0)),
        scratch_shapes=[pltpu.VMEM((tn, 1), jnp.float32)],
        compiler_params=pltpu.CompilerParams(**cp_kwargs),
    )(est2d, gt2d)

    # Add per-group partial sums (tiny) and square outside the kernel.
    row_sum = jnp.sum(partials[:, :n, 0], axis=0)
    return row_sum * row_sum


if __name__ == "__main__":
    key = jax.random.PRNGKey(0)
    k1, k2, k3, k4 = jax.random.split(key, 4)

    # Main case: natural small NCHW inputs for the module.
    N, C, H, W = 2, 4, 16, 16
    est = jax.random.uniform(k1, (N, C, H, W), dtype=jnp.float32)
    gt = jax.random.uniform(k2, (N, C, H, W), dtype=jnp.float32)

    result = se_batch(est, gt)
    jax.block_until_ready(result)

    ref = jnp.power(jnp.sum(est - gt, axis=(1, 2, 3)), 2)
    assert result.shape == (N,)
    assert jnp.allclose(result, ref, rtol=1e-4, atol=1e-5)

    # Extra check: shrink the block budget so the small inputs exercise the
    # same paths large maps hit (multi F/N blocks, ragged-tail mask, 2-group
    # split with clamped index map, boundary-row discard).
    N2, C2, H2, W2 = 10, 4, 17, 16
    est2 = jax.random.uniform(k3, (N2, C2, H2, W2), dtype=jnp.float32)
    gt2 = jax.random.uniform(k4, (N2, C2, H2, W2), dtype=jnp.float32)
    ref2 = jnp.power(jnp.sum(est2 - gt2, axis=(1, 2, 3)), 2)

    res_multi_n = se_batch(est2, gt2, block_bytes_override=16 * 1024)
    jax.block_until_ready(res_multi_n)
    assert res_multi_n.shape == (N2,)
    assert jnp.allclose(res_multi_n, ref2, rtol=1e-4, atol=1e-5)

    res_grouped = se_batch(est2[:2], gt2[:2], block_bytes_override=16 * 1024)
    jax.block_until_ready(res_grouped)
    assert jnp.allclose(res_grouped, ref2[:2], rtol=1e-4, atol=1e-5)

    print("KERNEL_OK")
</pallas_src>

<mosaic_0001>
module attributes {stable_mosaic.version = 11 : i64} {
  func.func @kernel(%arg0: i32, %arg1: i32, %arg2: i32, %arg3: memref<2x1024xf32, #tpu.memory_space<vmem>>, %arg4: memref<2x1024xf32, #tpu.memory_space<vmem>>, %arg5: memref<1x2x1xf32, #tpu.memory_space<vmem>>, %arg6: memref<2x1xf32, #tpu.memory_space<vmem>>) attributes {dimension_semantics = [#tpu.dimension_semantics<parallel>, #tpu.dimension_semantics<parallel>, #tpu.dimension_semantics<arbitrary>], iteration_bounds = array<i64: 1, 1, 1>, scalar_prefetch = 0 : i64, scratch_operands = 1 : i64, tpu.core_type = #tpu.core_type<tc>, window_params = [{transform_indices = @transform_0, window_bounds = array<i64: 2, 1024>}, {transform_indices = @transform_1, window_bounds = array<i64: 2, 1024>}, {transform_indices = @transform_2, window_bounds = array<i64: 1, 2, 1>}]} {
    %c0_i32 = arith.constant 0 : i32
    %0 = arith.cmpi eq, %arg2, %c0_i32 : i32
    %1 = arith.extui %0 : i1 to i32
    %c0_i32_0 = arith.constant 0 : i32
    %2 = arith.cmpi ne, %1, %c0_i32_0 : i32
    scf.if %2 {
      %cst_10 = arith.constant 0.000000e+00 : f32
      %14 = vector.broadcast %cst_10 : f32 to vector<2x1xf32>
      %c0_11 = arith.constant 0 : index
      %c0_12 = arith.constant 0 : index
      %15 = vector.load %arg6[%c0_11, %c0_12] : memref<2x1xf32, #tpu.memory_space<vmem>>, vector<2x1xf32>
      tpu.vector_store %arg6[%c0_11, %c0_12], %14 {strides = array<i32>} : memref<2x1xf32, #tpu.memory_space<vmem>>, vector<2x1xf32>,
    } else {
    }
    %c0 = arith.constant 0 : index
    %c0_1 = arith.constant 0 : index
    %3 = vector.load %arg3[%c0, %c0_1] : memref<2x1024xf32, #tpu.memory_space<vmem>>, vector<2x1024xf32>
    %c0_2 = arith.constant 0 : index
    %c0_3 = arith.constant 0 : index
    %4 = vector.load %arg4[%c0_2, %c0_3] : memref<2x1024xf32, #tpu.memory_space<vmem>>, vector<2x1024xf32>
    %5 = arith.subf %3, %4 : vector<2x1024xf32>
    %c0_4 = arith.constant 0 : index
    %c0_5 = arith.constant 0 : index
    %6 = vector.load %arg6[%c0_4, %c0_5] : memref<2x1xf32, #tpu.memory_space<vmem>>, vector<2x1xf32>
    %cst = arith.constant dense<0.000000e+00> : vector<2xf32>
    %7 = vector.multi_reduction <add>, %5, %cst [1] : vector<2x1024xf32> to vector<2xf32>
    %8 = vector.shape_cast %7 : vector<2xf32> to vector<2x1xf32>
    %9 = arith.addf %6, %8 : vector<2x1xf32>
    %c0_6 = arith.constant 0 : index
    %c0_7 = arith.constant 0 : index
    %10 = vector.load %arg6[%c0_6, %c0_7] : memref<2x1xf32, #tpu.memory_space<vmem>>, vector<2x1xf32>
    tpu.vector_store %arg6[%c0_6, %c0_7], %9 {strides = array<i32>} : memref<2x1xf32, #tpu.memory_space<vmem>>, vector<2x1xf32>,
    %c0_i32_8 = arith.constant 0 : i32
    %11 = arith.cmpi eq, %arg2, %c0_i32_8 : i32
    %12 = arith.extui %11 : i1 to i32
    %c0_i32_9 = arith.constant 0 : i32
    %13 = arith.cmpi ne, %12, %c0_i32_9 : i32
    scf.if %13 {
      %c0_10 = arith.constant 0 : index
      %c0_11 = arith.constant 0 : index
      %14 = vector.load %arg6[%c0_10, %c0_11] : memref<2x1xf32, #tpu.memory_space<vmem>>, vector<2x1xf32>
      %15 = vector.shape_cast %14 : vector<2x1xf32> to vector<1x2x1xf32>
      %c0_12 = arith.constant 0 : index
      %c0_13 = arith.constant 0 : index
      %c0_14 = arith.constant 0 : index
      %16 = vector.load %arg5[%c0_12, %c0_13, %c0_14] : memref<1x2x1xf32, #tpu.memory_space<vmem>>, vector<1x2x1xf32>
      tpu.vector_store %arg5[%c0_12, %c0_13, %c0_14], %15 {strides = array<i32>} : memref<1x2x1xf32, #tpu.memory_space<vmem>>, vector<1x2x1xf32>,
    } else {
    }
    return
  }
  func.func @transform_0(%arg0: i32, %arg1: i32, %arg2: i32) -> (i32, i32) {
    %c1_i32 = arith.constant 1 : i32
    %0 = arith.muli %arg1, %c1_i32 : i32
    %1 = arith.addi %0, %arg2 : i32
    %c0_i32 = arith.constant 0 : i32
    return %arg0, %1 : i32, i32
  }
  func.func @transform_1(%arg0: i32, %arg1: i32, %arg2: i32) -> (i32, i32) {
    %c1_i32 = arith.constant 1 : i32
    %0 = arith.muli %arg1, %c1_i32 : i32
    %1 = arith.addi %0, %arg2 : i32
    %c0_i32 = arith.constant 0 : i32
    return %arg0, %1 : i32, i32
  }
  func.func @transform_2(%arg0: i32, %arg1: i32, %arg2: i32) -> (i32, i32, i32) {
    %c0_i32 = arith.constant 0 : i32
    %c0_i32_0 = arith.constant 0 : i32
    return %arg1, %arg0, %c0_i32 : i32, i32, i32
  }
}

</mosaic_0001>

<bundles_post_ra>
// kernel: tpu_custom_call.1
= control target key start
LH: loop header
LB: loop body
LE: loop exit
PB: predicated region body
PF: predicated region fallthrough
CT: control target
= control target key end

     0   :  { %7 = vsyncpa [#allocation4], 0  ;;  %s223_s0 = inlined_call_operand.hbm [shape: f32[2,1024], index: 0, kind: input, shape index: {}]   ;;  %s224_s1 = inlined_call_operand.hbm [shape: f32[2,1024], index: 1, kind: input, shape index: {}]   ;;  %s225_s2 = inlined_call_operand.vmem [shape: f32[1,2,1], index: 2, kind: output, shape index: {}]  }
   0x1   :  { %8 = vsyncpa [#allocation6], 0  ;;  %s184_s9 = smov [#allocation3]   ;;  %s185_s11 = smov [#allocation5]  }
   0x2   :  { %s19_s10 = sshll.u32 %s184_s9, 4  ;;  %s33_s12 = sshll.u32 %s185_s11, 4  ;;  %s20_s10 = int_to_ptr.vmem [resolvable:$true] %s19_s10  ;;  %s34_s12 = int_to_ptr.vmem [resolvable:$true] %s33_s12 }
   0x3   :  { %s148_s13 = scalar_lea.vmem %s20_s10, 256  ;;  %p153_p1 = scmp.lt.s32.totalorder %s20_s10, %s20_s10 }
   0x4   :  { %p149_p0 = scmp.ne.s32.totalorder %s20_s10, %s148_s13  ;;  %p154_p2 = scmp.lt.s32.totalorder %s148_s13, %s148_s13 }
   0x6   :  { %p155_p3 = por %p154_p2, %p153_p1 }
   0x8   :  { %p156_p4 = pnand %p155_p3, %p149_p0 }
   0xa   :  { %159 = shalt.err (!%p156_p4)
}
   0xb   :  { %22 = dma.hbm_to_vmem [thread:$0]  %s223_s0, 256, %s20_s10, [#allocation4]  }
   0xc   :  { %s168_s16 = scalar_lea.vmem %s34_s12, 256  ;;  %p173_p6 = scmp.lt.s32.totalorder %s34_s12, %s34_s12 }
   0xd   :  { %p169_p5 = scmp.ne.s32.totalorder %s34_s12, %s168_s16  ;;  %p174_p7 = scmp.lt.s32.totalorder %s168_s16, %s168_s16 }
   0xf   :  { %p175_p8 = por %p174_p7, %p173_p6 }
  0x11   :  { %p176_p9 = pnand %p175_p8, %p169_p5 }
  0x13   :  { %179 = shalt.err (!%p176_p9)
}
  0x14   :  { %36 = dma.hbm_to_vmem [thread:$0]  %s224_s1, 256, %s34_s12, [#allocation6]  }
  0x15   :  { %180 = dma.done.wait [#allocation4], 256  }
  0x16   :  { %181 = vsyncadd [#allocation4], 4294967040 }
  0x17   :  { %182 = dma.done.wait [#allocation6], 256  }
  0x18   :  { %183 = vsyncadd [#allocation6], 4294967040  ;;  %v66_v0 = vlaneseq  ;;  %vm51_vm0 = vcmask 1024   ;;  %v186_v1 = vmov 1983009808   ;;  %v187_v4 = vmov 0.0  }
  0x19   :  { %v64_v2 = vunpack.c.l.s4 %v186_v1  ;;  %52 = vst.msk [vmem:[#allocation2] sm:$0x3] %vm51_vm0, %v187_v4  ;;  %v53_v7 = vld [vmem:[#allocation3] sm:$0xff]  ;;  %v54_v8 = vld [vmem:[#allocation3 + $0x8] sm:$0xff]  ;;  %v55_v9 = vld [vmem:[#allocation5] sm:$0xff]  ;;  %vm104_vm1 = vcmask 1041408  }
  0x1a   :  { %v67_v3 = vshrl.u32 %v66_v0, 7  ;;  %v56_v10 = vld [vmem:[#allocation5 + $0x8] sm:$0xff]  ;;  %v57_v11 = vsub.f32 %v53_v7, %v55_v9 }
  0x1b   :  { %v65_v5 = vunpack.c.0.s8 %v64_v2  ;;  %v58_v12 = vsub.f32 %v54_v8, %v56_v10 }
  0x1c   :  { %v62_v13 = vcombine.high %v57_v11, %v57_v11 }
  0x1d   :  { %v68_v6 = vsub.s32 %v65_v5, %v67_v3  ;;  %v79_v15 = vcombine.high %v58_v12, %v58_v12 }
  0x1f   :  { %v69_v14 = vrot.slane %v57_v11, %v68_v6  ;;  %v76_v16 = vrot.slane %v62_v13, %v68_v6  ;;  %v86_v18 = vrot.slane %v58_v12, %v68_v6  ;;  %v93_v24 = vrot.slane %v79_v15, %v68_v6 }
  0x20   :  { %v59_v38 = vld [vmem:[#allocation2] sm:$0x3] }
  0x21   :  { %v77_v17 = vcombine.high %v69_v14, %v69_v14  ;;  %v105_v19 = vsel %vm104_vm1, %v69_v14, 0.0  ;;  %v78_v20 = vcombine.high %v76_v16, %v76_v16  ;;  %v108_v22 = vsel %vm104_vm1, %v76_v16, 0.0 }
  0x22   :  { %v94_v25 = vcombine.high %v86_v18, %v86_v18  ;;  %v112_v28 = vsel %vm104_vm1, %v86_v18, 0.0  ;;  %v95_v30 = vcombine.high %v93_v24, %v93_v24  ;;  %v116_v33 = vsel %vm104_vm1, %v93_v24, 0.0 }
  0x23   :  { %v106_v21 = vsel %vm104_vm1, %v77_v17, 0.0  ;;  %v110_v26 = vsel %vm104_vm1, %v78_v20, 0.0 }
  0x24   :  { %v107_v23 = vadd.f32 %v106_v21, %v105_v19  ;;  %v114_v31 = vsel %vm104_vm1, %v94_v25, 0.0  ;;  %v118_v35 = vsel %vm104_vm1, %v95_v30, 0.0 }
  0x26   :  { %v109_v27 = vadd.f32 %v108_v22, %v107_v23 }
  0x28   :  { %v111_v29 = vadd.f32 %v110_v26, %v109_v27 }
  0x2a   :  { %v113_v32 = vadd.f32 %v112_v28, %v111_v29 }
  0x2c   :  { %v115_v34 = vadd.f32 %v114_v31, %v113_v32 }
  0x2e   :  { %v117_v36 = vadd.f32 %v116_v33, %v115_v34 }
  0x30   :  { %v119_v37 = vadd.f32 %v118_v35, %v117_v36 }
  0x32   :  { %120 = vadd.xlane.f32.xlu0 %v119_v37 }
  0xbb   :  { %v121_v39 = vpop.xlane.xlu0 %120 }
  0xbc   :  { %v122_v40 = vadd.f32 %v121_v39, %v59_v38 }
  0xbe   :  { %124 = vst.msk [vmem:[#allocation2] sm:$0x3] %vm51_vm0, %v122_v40 }
  0xc5   :  { %v128_v41 = vld [vmem:[#allocation2] sm:$0x3] }
  0xc6   :  { %129 = vst.msk [vmem:[%s225_s2] sm:$0x3] %vm51_vm0, %v128_v41 }
  0xc7   :  { %134 = vsyncpa [#allocation4], 1 }
  0xc8   :  { %135 = vsyncpa [#allocation6], 1 }

</bundles_post_ra>
